<compile_context>
chip_gen: v7x
topology: tpu7x:2x2x1
jax: 0.10.0
libtpu: 0.0.40
codegen_flags: <defaults>
</compile_context>

<pallas_src>
import jax
import jax.numpy as jnp
from jax.experimental import pallas as pl
from jax.experimental.pallas import tpu as pltpu

NUM_FOR_NONE = 0
VOCAB_PAD = 128      # pad vocab so the one-hot gather is a lane-dense, 128-deep matmul
OUT_PAD = 128        # pad the 2-class head so the final store is lane-dense


def _round_up(v, m):
    return ((v + m - 1) // m) * m


def win_pred_kernel(x_ref, tab_ref, w1_ref, b1_ref, w2_ref, b2_ref,
                    fw1_ref, fb1_ref, fw2_ref, fb2_ref, out_ref,
                    emb_ref, lhs1_ref, h1_ref, lhs2_ref):
    TBL = x_ref.shape[0]                 # batch_tile * L token rows in this tile
    VP, H = tab_ref.shape                # padded vocab, hidden
    KH1, H2 = w1_ref.shape               # (K1*H,  H//2)  im2col conv1 weight
    KH2, H4 = w2_ref.shape               # (K2*H2, H//4)  im2col conv2 weight
    TB = out_ref.shape[0]                # batch tile
    K1 = KH1 // H
    K2 = KH2 // H2
    L = TBL // TB                        # sequence length
    L2 = L - K1 - K2 + 2                 # valid length after both valid convs

    x = x_ref[...]                                                     # (TBL, 1) int32

    # ---- embedding gather: one-hot built by a single compare straight to bf16 (MXU dot) ----
    vocab_iota = jax.lax.broadcasted_iota(jnp.int32, (TBL, VP), 1)
    onehot = (x == vocab_iota).astype(jnp.bfloat16)                    # (TBL, VP)
    emb = jnp.dot(onehot, tab_ref[...],
                  preferred_element_type=jnp.float32)                  # (TBL, H) f32

    # ---- padding mask applied on the narrow H-lane embedding; sequence position 0 exempt ----
    row = jax.lax.broadcasted_iota(jnp.int32, (TBL, 1), 0)
    pos = row % L                                                      # position within seq
    keep = jnp.logical_or(x != NUM_FOR_NONE, pos == 0)                 # (TBL, 1) bool
    emb = jnp.where(keep, emb, 0.0).astype(jnp.bfloat16)

    # ---- stage embedding in VMEM with a zeroed (K1-1)-row halo for the shifted windows ----
    emb_ref[:TBL, :] = emb
    emb_ref[TBL:, :] = jnp.zeros((K1 - 1, H), jnp.bfloat16)

    # ---- Conv1d #1 (k=4): im2col assembled by static-offset scratch stores, one 2D matmul ----
    for k in range(K1):
        lhs1_ref[:, k * H:(k + 1) * H] = emb_ref[k:k + TBL, :]
    h1 = jnp.dot(lhs1_ref[...], w1_ref[...],
                 preferred_element_type=jnp.float32)                   # (TBL, H2)
    h1 = jnp.maximum(h1 + b1_ref[...], 0.0).astype(jnp.bfloat16)
    h1_ref[:TBL, :] = h1
    h1_ref[TBL:, :] = jnp.zeros((K2 - 1, H2), jnp.bfloat16)

    # ---- Conv1d #2 (k=3): same im2col-in-scratch scheme ----
    for k in range(K2):
        lhs2_ref[:, k * H2:(k + 1) * H2] = h1_ref[k:k + TBL, :]
    h2 = jnp.dot(lhs2_ref[...], w2_ref[...],
                 preferred_element_type=jnp.float32)                   # (TBL, H4)
    h2 = jnp.maximum(h2 + b2_ref[...], 0.0).astype(jnp.bfloat16)

    # ---- mean over the L2 valid conv positions as a (TB, TBL) x (TBL, H4) matmul ----
    # pool[b, r] = 1 iff row r is a valid conv-output row of sequence b; rows whose window
    # crossed a sequence boundary (or the zero halo) get weight 0 and never pollute.
    prow = jax.lax.broadcasted_iota(jnp.int32, (TB, TBL), 0)
    pcol = jax.lax.broadcasted_iota(jnp.int32, (TB, TBL), 1)
    lo = prow * L
    pool = jnp.logical_and(pcol >= lo, pcol < lo + L2).astype(jnp.bfloat16)
    pooled = jnp.dot(pool, h2, preferred_element_type=jnp.float32) * jnp.float32(1.0 / L2)

    # ---- fc_layers: Linear -> ReLU -> Linear (bf16 operands, f32 accumulation) ----
    f1 = jnp.dot(pooled.astype(jnp.bfloat16), fw1_ref[...],
                 preferred_element_type=jnp.float32) + fb1_ref[...]    # (TB, H)
    f1 = jnp.maximum(f1, 0.0).astype(jnp.bfloat16)
    logits = jnp.dot(f1, fw2_ref[...],
                     preferred_element_type=jnp.float32) + fb2_ref[...]  # (TB, OUT_PAD)

    # ---- softmax over the 2 real classes; padded lanes forced to -inf so exp() = 0 ----
    lane = jax.lax.broadcasted_iota(jnp.int32, logits.shape, 1)
    logits = jnp.where(lane < 2, logits, jnp.float32(-1e30))
    m = jnp.max(logits, axis=1, keepdims=True)
    e = jnp.exp(logits - m)
    out_ref[...] = e * pl.reciprocal(jnp.sum(e, axis=1, keepdims=True), approx=True)


def win_prediction_forward(x, params, *, batch_tile=256):
    """x: int32 (B, L) token indices. Returns (B, 2) softmax probabilities."""
    B, L = x.shape
    tab = params['embedding']                         # (VOCAB_PAD, H) bf16
    VP, H = tab.shape
    KH1, H2 = params['w1c'].shape
    KH2, H4 = params['w2c'].shape
    K1, K2 = KH1 // H, KH2 // H2
    L2 = L - K1 - K2 + 2
    assert L2 >= 1, "sequence too short for both valid convs (need L >= 6)"

    # Batch tile: large (fills the MXU rows / amortizes the ~0.35us per-step overhead),
    # a multiple of 8, and for big B chosen so the grid has >= 2 steps (v7x has 2 TCs).
    if B <= 8:
        TB = B                                        # tiny batches: single full tile
    else:
        TB = min(batch_tile, _round_up((B + 1) // 2, 8))
    Bp = _round_up(B, TB)
    if Bp != B:
        x = jnp.pad(x, ((0, Bp - B), (0, 0)))         # padded rows sliced off below
    x_flat = x.reshape(Bp * L, 1).astype(jnp.int32)   # token rows, flattened outside kernel
    TBL = TB * L
    grid = (Bp // TB,)

    def full_spec(a):                                 # whole array, resident across grid steps
        return pl.BlockSpec(a.shape, lambda i, _nd=a.ndim: (0,) * _nd)

    # Per-tile VMEM footprint (double-buffered I/O tiles + resident weights + scratch +
    # headroom for in-kernel intermediates), capped well under v7x's 64 MiB physical VMEM.
    weight_bytes = sum(int(v.size) * v.dtype.itemsize for v in params.values())
    scratch_bytes = 2 * ((TBL + K1) * H + TBL * KH1 + (TBL + K2) * H2 + TBL * KH2)
    io_bytes = 2 * (TBL * 4 + TB * OUT_PAD * 4)
    interm_bytes = (TBL * VP * 2 + TBL * H * 6 + TB * TBL * 6
                    + TBL * (H2 + H4) * 6 + TB * (H + OUT_PAD) * 8)
    vmem_limit = int(min(32 << 20,
                         max(16 << 20,
                             2 * (2 * weight_bytes + scratch_bytes + io_bytes + interm_bytes))))

    flops = 2 * Bp * L * (VP * H + KH1 * H2 + KH2 * H4 + H4) + 2 * Bp * (H4 * H + H * OUT_PAD)
    bytes_accessed = int(x_flat.size) * 4 + weight_bytes + Bp * OUT_PAD * 4

    out = pl.pallas_call(
        win_pred_kernel,
        out_shape=jax.ShapeDtypeStruct((Bp, OUT_PAD), jnp.float32),
        grid=grid,
        in_specs=[
            pl.BlockSpec((TBL, 1), lambda i: (i, 0)),  # token rows, tiled over batch
            full_spec(tab),
            full_spec(params['w1c']), full_spec(params['b1']),
            full_spec(params['w2c']), full_spec(params['b2']),
            full_spec(params['fw1']), full_spec(params['fb1']),
            full_spec(params['fw2']), full_spec(params['fb2']),
        ],
        out_specs=pl.BlockSpec((TB, OUT_PAD), lambda i: (i, 0)),
        scratch_shapes=[
            pltpu.VMEM((TBL + K1 - 1, H), jnp.bfloat16),   # staged embedding (+ zero halo)
            pltpu.VMEM((TBL, KH1), jnp.bfloat16),          # im2col operand, conv1
            pltpu.VMEM((TBL + K2 - 1, H2), jnp.bfloat16),  # staged conv1 output (+ halo)
            pltpu.VMEM((TBL, KH2), jnp.bfloat16),          # im2col operand, conv2
        ],
        compiler_params=pltpu.CompilerParams(
            dimension_semantics=("parallel",),        # shards batch tiles across 2 TCs on v7x
            vmem_limit_bytes=vmem_limit),
        cost_estimate=pl.CostEstimate(
            flops=flops,
            transcendentals=Bp * (OUT_PAD + 1),
            bytes_accessed=bytes_accessed),
    )(x_flat, tab, params['w1c'], params['b1'], params['w2c'], params['b2'],
      params['fw1'], params['fb1'], params['fw2'], params['fb2'])
    return out[:B, :2]


def init_params(key, hidden_size, vocab_size):
    """Parameters in kernel layout.

    Mapping from the PyTorch module:
      embedding : nn.Embedding.weight (V, H), zero-padded to (VOCAB_PAD, H), bf16
      w1c       : conv1.weight (H/2, H, 4)  -> concat_k(weight[:, :, k].T) = (4*H,  H/2), bf16
      w2c       : conv2.weight (H/4, H/2, 3)-> concat_k(weight[:, :, k].T) = (3*H/2, H/4), bf16
      fw1, fw2  : fc weights transposed to (in, out), bf16; fw2/fb2 zero-padded to 128 out lanes
      biases    : kept in f32 (added to the f32 matmul accumulators)
    """
    H = hidden_size
    H2, H4 = H // 2, H // 4
    K1, K2 = 4, 3
    assert vocab_size <= VOCAB_PAD
    ks = jax.random.split(key, 9)
    s = 0.1

    emb = s * jax.random.normal(ks[0], (vocab_size, H), jnp.float32)
    emb = jnp.zeros((VOCAB_PAD, H), jnp.float32).at[:vocab_size].set(emb)

    w1 = s * jax.random.normal(ks[1], (H2, H, K1), jnp.float32)        # conv1.weight
    w1c = jnp.concatenate([w1[:, :, k].T for k in range(K1)], axis=0)  # (K1*H, H2)
    w2 = s * jax.random.normal(ks[3], (H4, H2, K2), jnp.float32)       # conv2.weight
    w2c = jnp.concatenate([w2[:, :, k].T for k in range(K2)], axis=0)  # (K2*H2, H4)

    fw1 = s * jax.random.normal(ks[5], (H4, H), jnp.float32)           # fc1.weight.T
    fw2 = s * jax.random.normal(ks[7], (H, 2), jnp.float32)            # fc2.weight.T
    fw2p = jnp.zeros((H, OUT_PAD), jnp.float32).at[:, :2].set(fw2)
    fb2 = s * jax.random.normal(ks[8], (1, 2), jnp.float32)
    fb2p = jnp.zeros((1, OUT_PAD), jnp.float32).at[:, :2].set(fb2)

    return {
        'embedding': emb.astype(jnp.bfloat16),
        'w1c': w1c.astype(jnp.bfloat16),
        'b1': s * jax.random.normal(ks[2], (1, H2), jnp.float32),
        'w2c': w2c.astype(jnp.bfloat16),
        'b2': s * jax.random.normal(ks[4], (1, H4), jnp.float32),
        'fw1': fw1.astype(jnp.bfloat16),
        'fb1': s * jax.random.normal(ks[6], (1, H), jnp.float32),
        'fw2': fw2p.astype(jnp.bfloat16),
        'fb2': fb2p,
    }


if __name__ == "__main__":
    key = jax.random.PRNGKey(0)
    k_param, k_x = jax.random.split(key)

    hidden_size = 32                 # H (H/2 = 16, H/4 = 8)
    num_cards, num_decks = 10, 4
    vocab_size = num_cards + num_decks + 2
    B, L = 2, 8                      # batch, sequence length (>= 6 so both convs are valid)

    params = init_params(k_param, hidden_size, vocab_size)
    x = jax.random.randint(k_x, (B, L), 0, vocab_size, dtype=jnp.int32)

    out = jax.block_until_ready(win_prediction_forward(x, params))
    assert out.shape == (B, 2)
    assert bool(jnp.all(jnp.isfinite(out)))
    assert bool(jnp.all(jnp.abs(jnp.sum(out, axis=1) - 1.0) < 5e-2))   # rows ~ probabilities
    print("KERNEL_OK")
</pallas_src>

<mosaic_0001>
module attributes {stable_mosaic.version = 11 : i64} {
  func.func @win_pred_kernel(%arg0: i32, %arg1: memref<16x1xi32, #tpu.memory_space<vmem>>, %arg2: memref<128x32xbf16, #tpu.memory_space<vmem>>, %arg3: memref<128x16xbf16, #tpu.memory_space<vmem>>, %arg4: memref<1x16xf32, #tpu.memory_space<vmem>>, %arg5: memref<48x8xbf16, #tpu.memory_space<vmem>>, %arg6: memref<1x8xf32, #tpu.memory_space<vmem>>, %arg7: memref<8x32xbf16, #tpu.memory_space<vmem>>, %arg8: memref<1x32xf32, #tpu.memory_space<vmem>>, %arg9: memref<32x128xbf16, #tpu.memory_space<vmem>>, %arg10: memref<1x128xf32, #tpu.memory_space<vmem>>, %arg11: memref<2x128xf32, #tpu.memory_space<vmem>>, %arg12: memref<19x32xbf16, #tpu.memory_space<vmem>>, %arg13: memref<16x128xbf16, #tpu.memory_space<vmem>>, %arg14: memref<18x16xbf16, #tpu.memory_space<vmem>>, %arg15: memref<16x48xbf16, #tpu.memory_space<vmem>>) attributes {dimension_semantics = [#tpu.dimension_semantics<parallel>], iteration_bounds = array<i64: 1>, scalar_prefetch = 0 : i64, scratch_operands = 4 : i64, tpu.core_type = #tpu.core_type<tc>, window_params = [{transform_indices = @transform_0, window_bounds = array<i64: 16, 1>}, {pipeline_mode = #tpu.pipeline_mode<synchronous>, transform_indices = @transform_1, window_bounds = array<i64: 128, 32>}, {pipeline_mode = #tpu.pipeline_mode<synchronous>, transform_indices = @transform_2, window_bounds = array<i64: 128, 16>}, {pipeline_mode = #tpu.pipeline_mode<synchronous>, transform_indices = @transform_3, window_bounds = array<i64: 1, 16>}, {pipeline_mode = #tpu.pipeline_mode<synchronous>, transform_indices = @transform_4, window_bounds = array<i64: 48, 8>}, {pipeline_mode = #tpu.pipeline_mode<synchronous>, transform_indices = @transform_5, window_bounds = array<i64: 1, 8>}, {pipeline_mode = #tpu.pipeline_mode<synchronous>, transform_indices = @transform_6, window_bounds = array<i64: 8, 32>}, {pipeline_mode = #tpu.pipeline_mode<synchronous>, transform_indices = @transform_7, window_bounds = array<i64: 1, 32>}, {pipeline_mode = #tpu.pipeline_mode<synchronous>, transform_indices = @transform_8, window_bounds = array<i64: 32, 128>}, {pipeline_mode = #tpu.pipeline_mode<synchronous>, transform_indices = @transform_9, window_bounds = array<i64: 1, 128>}, {transform_indices = @transform_10, window_bounds = array<i64: 2, 128>}]} {
    %c0 = arith.constant 0 : index
    %c0_0 = arith.constant 0 : index
    %0 = vector.load %arg1[%c0, %c0_0] : memref<16x1xi32, #tpu.memory_space<vmem>>, vector<16x1xi32>
    %1 = tpu.iota {dimensions = array<i32: 1>} : vector<16x128xi32>
    %2 = vector.broadcast %0 : vector<16x1xi32> to vector<16x128xi32>
    %3 = arith.cmpi eq, %2, %1 : vector<16x128xi32>
    %4 = arith.extui %3 : vector<16x128xi1> to vector<16x128xi32>
    %5 = arith.sitofp %4 : vector<16x128xi32> to vector<16x128xf32>
    %6 = arith.truncf %5 : vector<16x128xf32> to vector<16x128xbf16>
    %c0_1 = arith.constant 0 : index
    %c0_2 = arith.constant 0 : index
    %7 = vector.load %arg2[%c0_1, %c0_2] : memref<128x32xbf16, #tpu.memory_space<vmem>>, vector<128x32xbf16>
    %cst = arith.constant dense<0.000000e+00> : vector<16x32xf32>
    %8 = tpu.matmul %6, %7, %cst {dimension_numbers = #tpu.dot_dimension_numbers<[1], [0], [0], [1], [0, 0, 1, 1], [], []>} : vector<16x128xbf16>, vector<128x32xbf16>, vector<16x32xf32> -> vector<16x32xf32>
    %9 = tpu.iota {dimensions = array<i32: 0>} : vector<16x1xi32>
    %c8_i32 = arith.constant 8 : i32
    %c0_i32 = arith.constant 0 : i32
    %10 = arith.cmpi eq, %c8_i32, %c0_i32 : i32
    %c1_i32 = arith.constant 1 : i32
    %11 = arith.select %10, %c1_i32, %c8_i32 : i32
    %12 = vector.broadcast %11 : i32 to vector<16x1xi32>
    %13 = arith.remsi %9, %12 : vector<16x1xi32>
    %c0_i32_3 = arith.constant 0 : i32
    %14 = vector.broadcast %c0_i32_3 : i32 to vector<16x1xi32>
    %15 = arith.cmpi ne, %13, %14 : vector<16x1xi32>
    %c0_i32_4 = arith.constant 0 : i32
    %16 = vector.broadcast %c0_i32_4 : i32 to vector<16x1xi32>
    %17 = arith.cmpi slt, %13, %16 : vector<16x1xi32>
    %c0_i32_5 = arith.constant 0 : i32
    %18 = arith.cmpi slt, %11, %c0_i32_5 : i32
    %19 = vector.broadcast %18 : i1 to vector<16x1xi1>
    %20 = vector.broadcast %19 : vector<16x1xi1> to vector<16x1xi1>
    %21 = arith.xori %17, %20 : vector<16x1xi1>
    %22 = arith.andi %21, %15 : vector<16x1xi1>
    %23 = vector.broadcast %11 : i32 to vector<16x1xi32>
    %24 = arith.addi %13, %23 : vector<16x1xi32>
    %25 = arith.select %22, %24, %13 : vector<16x1xi1>, vector<16x1xi32>
    %c0_i32_6 = arith.constant 0 : i32
    %26 = vector.broadcast %c0_i32_6 : i32 to vector<16x1xi32>
    %27 = arith.cmpi ne, %0, %26 : vector<16x1xi32>
    %c0_i32_7 = arith.constant 0 : i32
    %28 = vector.broadcast %c0_i32_7 : i32 to vector<16x1xi32>
    %29 = arith.cmpi eq, %25, %28 : vector<16x1xi32>
    %30 = arith.ori %27, %29 : vector<16x1xi1>
    %cst_8 = arith.constant 0.000000e+00 : f32
    %31 = vector.shape_cast %30 : vector<16x1xi1> to vector<16x1xi1>
    %32 = vector.broadcast %31 : vector<16x1xi1> to vector<16x32xi1>
    %33 = vector.broadcast %cst_8 : f32 to vector<16x32xf32>
    %34 = arith.select %32, %8, %33 : vector<16x32xi1>, vector<16x32xf32>
    %35 = arith.truncf %34 : vector<16x32xf32> to vector<16x32xbf16>
    %c0_9 = arith.constant 0 : index
    %c0_10 = arith.constant 0 : index
    %36 = vector.load %arg12[%c0_9, %c0_10] : memref<19x32xbf16, #tpu.memory_space<vmem>>, vector<16x32xbf16>
    tpu.vector_store %arg12[%c0_9, %c0_10], %35 {strides = array<i32>} : memref<19x32xbf16, #tpu.memory_space<vmem>>, vector<16x32xbf16>,
    %cst_11 = arith.constant 0.000000e+00 : bf16
    %37 = vector.broadcast %cst_11 : bf16 to vector<3x32xbf16>
    %c16 = arith.constant 16 : index
    %c0_12 = arith.constant 0 : index
    %38 = vector.load %arg12[%c16, %c0_12] : memref<19x32xbf16, #tpu.memory_space<vmem>>, vector<3x32xbf16>
    tpu.vector_store %arg12[%c16, %c0_12], %37 {strides = array<i32>} : memref<19x32xbf16, #tpu.memory_space<vmem>>, vector<3x32xbf16>,
    %c0_13 = arith.constant 0 : index
    %c0_14 = arith.constant 0 : index
    %39 = vector.load %arg12[%c0_13, %c0_14] : memref<19x32xbf16, #tpu.memory_space<vmem>>, vector<16x32xbf16>
    %c0_15 = arith.constant 0 : index
    %c0_16 = arith.constant 0 : index
    %40 = vector.load %arg13[%c0_15, %c0_16] : memref<16x128xbf16, #tpu.memory_space<vmem>>, vector<16x32xbf16>
    tpu.vector_store %arg13[%c0_15, %c0_16], %39 {strides = array<i32>} : memref<16x128xbf16, #tpu.memory_space<vmem>>, vector<16x32xbf16>,
    %c1 = arith.constant 1 : index
    %c0_17 = arith.constant 0 : index
    %41 = vector.load %arg12[%c1, %c0_17] : memref<19x32xbf16, #tpu.memory_space<vmem>>, vector<16x32xbf16>
    %c0_18 = arith.constant 0 : index
    %c32 = arith.constant 32 : index
    %42 = vector.load %arg13[%c0_18, %c32] : memref<16x128xbf16, #tpu.memory_space<vmem>>, vector<16x32xbf16>
    tpu.vector_store %arg13[%c0_18, %c32], %41 {strides = array<i32>} : memref<16x128xbf16, #tpu.memory_space<vmem>>, vector<16x32xbf16>,
    %c2 = arith.constant 2 : index
    %c0_19 = arith.constant 0 : index
    %43 = vector.load %arg12[%c2, %c0_19] : memref<19x32xbf16, #tpu.memory_space<vmem>>, vector<16x32xbf16>
    %c0_20 = arith.constant 0 : index
    %c64 = arith.constant 64 : index
    %44 = vector.load %arg13[%c0_20, %c64] : memref<16x128xbf16, #tpu.memory_space<vmem>>, vector<16x32xbf16>
    tpu.vector_store %arg13[%c0_20, %c64], %43 {strides = array<i32>} : memref<16x128xbf16, #tpu.memory_space<vmem>>, vector<16x32xbf16>,
    %c3 = arith.constant 3 : index
    %c0_21 = arith.constant 0 : index
    %45 = vector.load %arg12[%c3, %c0_21] : memref<19x32xbf16, #tpu.memory_space<vmem>>, vector<16x32xbf16>
    %c0_22 = arith.constant 0 : index
    %c96 = arith.constant 96 : index
    %46 = vector.load %arg13[%c0_22, %c96] : memref<16x128xbf16, #tpu.memory_space<vmem>>, vector<16x32xbf16>
    tpu.vector_store %arg13[%c0_22, %c96], %45 {strides = array<i32>} : memref<16x128xbf16, #tpu.memory_space<vmem>>, vector<16x32xbf16>,
    %c0_23 = arith.constant 0 : index
    %c0_24 = arith.constant 0 : index
    %47 = vector.load %arg13[%c0_23, %c0_24] : memref<16x128xbf16, #tpu.memory_space<vmem>>, vector<16x128xbf16>
    %c0_25 = arith.constant 0 : index
    %c0_26 = arith.constant 0 : index
    %48 = vector.load %arg3[%c0_25, %c0_26] : memref<128x16xbf16, #tpu.memory_space<vmem>>, vector<128x16xbf16>
    %cst_27 = arith.constant dense<0.000000e+00> : vector<16x16xf32>
    %49 = tpu.matmul %47, %48, %cst_27 {dimension_numbers = #tpu.dot_dimension_numbers<[1], [0], [0], [1], [0, 0, 1, 1], [], []>} : vector<16x128xbf16>, vector<128x16xbf16>, vector<16x16xf32> -> vector<16x16xf32>
    %c0_28 = arith.constant 0 : index
    %c0_29 = arith.constant 0 : index
    %50 = vector.load %arg4[%c0_28, %c0_29] : memref<1x16xf32, #tpu.memory_space<vmem>>, vector<1x16xf32>
    %51 = vector.broadcast %50 : vector<1x16xf32> to vector<16x16xf32>
    %52 = arith.addf %49, %51 : vector<16x16xf32>
    %cst_30 = arith.constant 0.000000e+00 : f32
    %53 = vector.broadcast %cst_30 : f32 to vector<16x16xf32>
    %54 = arith.maximumf %52, %53 : vector<16x16xf32>
    %55 = arith.truncf %54 : vector<16x16xf32> to vector<16x16xbf16>
    %c0_31 = arith.constant 0 : index
    %c0_32 = arith.constant 0 : index
    %56 = vector.load %arg14[%c0_31, %c0_32] : memref<18x16xbf16, #tpu.memory_space<vmem>>, vector<16x16xbf16>
    tpu.vector_store %arg14[%c0_31, %c0_32], %55 {strides = array<i32>} : memref<18x16xbf16, #tpu.memory_space<vmem>>, vector<16x16xbf16>,
    %cst_33 = arith.constant 0.000000e+00 : bf16
    %57 = vector.broadcast %cst_33 : bf16 to vector<2x16xbf16>
    %c16_34 = arith.constant 16 : index
    %c0_35 = arith.constant 0 : index
    %58 = vector.load %arg14[%c16_34, %c0_35] : memref<18x16xbf16, #tpu.memory_space<vmem>>, vector<2x16xbf16>
    tpu.vector_store %arg14[%c16_34, %c0_35], %57 {strides = array<i32>} : memref<18x16xbf16, #tpu.memory_space<vmem>>, vector<2x16xbf16>,
    %c0_36 = arith.constant 0 : index
    %c0_37 = arith.constant 0 : index
    %59 = vector.load %arg14[%c0_36, %c0_37] : memref<18x16xbf16, #tpu.memory_space<vmem>>, vector<16x16xbf16>
    %c0_38 = arith.constant 0 : index
    %c0_39 = arith.constant 0 : index
    %60 = vector.load %arg15[%c0_38, %c0_39] : memref<16x48xbf16, #tpu.memory_space<vmem>>, vector<16x16xbf16>
    tpu.vector_store %arg15[%c0_38, %c0_39], %59 {strides = array<i32>} : memref<16x48xbf16, #tpu.memory_space<vmem>>, vector<16x16xbf16>,
    %c1_40 = arith.constant 1 : index
    %c0_41 = arith.constant 0 : index
    %61 = vector.load %arg14[%c1_40, %c0_41] : memref<18x16xbf16, #tpu.memory_space<vmem>>, vector<16x16xbf16>
    %c0_42 = arith.constant 0 : index
    %c16_43 = arith.constant 16 : index
    %62 = vector.load %arg15[%c0_42, %c16_43] : memref<16x48xbf16, #tpu.memory_space<vmem>>, vector<16x16xbf16>
    tpu.vector_store %arg15[%c0_42, %c16_43], %61 {strides = array<i32>} : memref<16x48xbf16, #tpu.memory_space<vmem>>, vector<16x16xbf16>,
    %c2_44 = arith.constant 2 : index
    %c0_45 = arith.constant 0 : index
    %63 = vector.load %arg14[%c2_44, %c0_45] : memref<18x16xbf16, #tpu.memory_space<vmem>>, vector<16x16xbf16>
    %c0_46 = arith.constant 0 : index
    %c32_47 = arith.constant 32 : index
    %64 = vector.load %arg15[%c0_46, %c32_47] : memref<16x48xbf16, #tpu.memory_space<vmem>>, vector<16x16xbf16>
    tpu.vector_store %arg15[%c0_46, %c32_47], %63 {strides = array<i32>} : memref<16x48xbf16, #tpu.memory_space<vmem>>, vector<16x16xbf16>,
    %c0_48 = arith.constant 0 : index
    %c0_49 = arith.constant 0 : index
    %65 = vector.load %arg15[%c0_48, %c0_49] : memref<16x48xbf16, #tpu.memory_space<vmem>>, vector<16x48xbf16>
    %c0_50 = arith.constant 0 : index
    %c0_51 = arith.constant 0 : index
    %66 = vector.load %arg5[%c0_50, %c0_51] : memref<48x8xbf16, #tpu.memory_space<vmem>>, vector<48x8xbf16>
    %cst_52 = arith.constant dense<0.000000e+00> : vector<16x8xf32>
    %67 = tpu.matmul %65, %66, %cst_52 {dimension_numbers = #tpu.dot_dimension_numbers<[1], [0], [0], [1], [0, 0, 1, 1], [], []>} : vector<16x48xbf16>, vector<48x8xbf16>, vector<16x8xf32> -> vector<16x8xf32>
    %c0_53 = arith.constant 0 : index
    %c0_54 = arith.constant 0 : index
    %68 = vector.load %arg6[%c0_53, %c0_54] : memref<1x8xf32, #tpu.memory_space<vmem>>, vector<1x8xf32>
    %69 = vector.broadcast %68 : vector<1x8xf32> to vector<16x8xf32>
    %70 = arith.addf %67, %69 : vector<16x8xf32>
    %cst_55 = arith.constant 0.000000e+00 : f32
    %71 = vector.broadcast %cst_55 : f32 to vector<16x8xf32>
    %72 = arith.maximumf %70, %71 : vector<16x8xf32>
    %73 = arith.truncf %72 : vector<16x8xf32> to vector<16x8xbf16>
    %74 = tpu.iota {dimensions = array<i32: 0>} : vector<2x16xi32>
    %75 = tpu.iota {dimensions = array<i32: 1>} : vector<2x16xi32>
    %c8_i32_56 = arith.constant 8 : i32
    %76 = vector.broadcast %c8_i32_56 : i32 to vector<2x16xi32>
    %77 = arith.muli %74, %76 : vector<2x16xi32>
    %78 = arith.cmpi sge, %75, %77 : vector<2x16xi32>
    %c3_i32 = arith.constant 3 : i32
    %79 = vector.broadcast %c3_i32 : i32 to vector<2x16xi32>
    %80 = arith.addi %77, %79 : vector<2x16xi32>
    %81 = arith.cmpi slt, %75, %80 : vector<2x16xi32>
    %82 = arith.andi %78, %81 : vector<2x16xi1>
    %83 = arith.extui %82 : vector<2x16xi1> to vector<2x16xi32>
    %84 = arith.sitofp %83 : vector<2x16xi32> to vector<2x16xf32>
    %85 = arith.truncf %84 : vector<2x16xf32> to vector<2x16xbf16>
    %cst_57 = arith.constant dense<0.000000e+00> : vector<2x8xf32>
    %86 = tpu.matmul %85, %73, %cst_57 {dimension_numbers = #tpu.dot_dimension_numbers<[1], [0], [0], [1], [0, 0, 1, 1], [], []>} : vector<2x16xbf16>, vector<16x8xbf16>, vector<2x8xf32> -> vector<2x8xf32>
    %cst_58 = arith.constant 0.333333343 : f32
    %87 = vector.broadcast %cst_58 : f32 to vector<2x8xf32>
    %88 = arith.mulf %86, %87 : vector<2x8xf32>
    %89 = arith.truncf %88 : vector<2x8xf32> to vector<2x8xbf16>
    %c0_59 = arith.constant 0 : index
    %c0_60 = arith.constant 0 : index
    %90 = vector.load %arg7[%c0_59, %c0_60] : memref<8x32xbf16, #tpu.memory_space<vmem>>, vector<8x32xbf16>
    %cst_61 = arith.constant dense<0.000000e+00> : vector<2x32xf32>
    %91 = tpu.matmul %89, %90, %cst_61 {dimension_numbers = #tpu.dot_dimension_numbers<[1], [0], [0], [1], [0, 0, 1, 1], [], []>} : vector<2x8xbf16>, vector<8x32xbf16>, vector<2x32xf32> -> vector<2x32xf32>
    %c0_62 = arith.constant 0 : index
    %c0_63 = arith.constant 0 : index
    %92 = vector.load %arg8[%c0_62, %c0_63] : memref<1x32xf32, #tpu.memory_space<vmem>>, vector<1x32xf32>
    %93 = vector.broadcast %92 : vector<1x32xf32> to vector<2x32xf32>
    %94 = arith.addf %91, %93 : vector<2x32xf32>
    %cst_64 = arith.constant 0.000000e+00 : f32
    %95 = vector.broadcast %cst_64 : f32 to vector<2x32xf32>
    %96 = arith.maximumf %94, %95 : vector<2x32xf32>
    %97 = arith.truncf %96 : vector<2x32xf32> to vector<2x32xbf16>
    %c0_65 = arith.constant 0 : index
    %c0_66 = arith.constant 0 : index
    %98 = vector.load %arg9[%c0_65, %c0_66] : memref<32x128xbf16, #tpu.memory_space<vmem>>, vector<32x128xbf16>
    %cst_67 = arith.constant dense<0.000000e+00> : vector<2x128xf32>
    %99 = tpu.matmul %97, %98, %cst_67 {dimension_numbers = #tpu.dot_dimension_numbers<[1], [0], [0], [1], [0, 0, 1, 1], [], []>} : vector<2x32xbf16>, vector<32x128xbf16>, vector<2x128xf32> -> vector<2x128xf32>
    %c0_68 = arith.constant 0 : index
    %c0_69 = arith.constant 0 : index
    %100 = vector.load %arg10[%c0_68, %c0_69] : memref<1x128xf32, #tpu.memory_space<vmem>>, vector<1x128xf32>
    %101 = vector.broadcast %100 : vector<1x128xf32> to vector<2x128xf32>
    %102 = arith.addf %99, %101 : vector<2x128xf32>
    %103 = tpu.iota {dimensions = array<i32: 1>} : vector<2x128xi32>
    %c2_i32 = arith.constant 2 : i32
    %104 = vector.broadcast %c2_i32 : i32 to vector<2x128xi32>
    %105 = arith.cmpi slt, %103, %104 : vector<2x128xi32>
    %cst_70 = arith.constant -1.000000e+30 : f32
    %106 = vector.broadcast %cst_70 : f32 to vector<2x128xf32>
    %107 = arith.select %105, %102, %106 : vector<2x128xi1>, vector<2x128xf32>
    %cst_71 = arith.constant dense<0xFF800000> : vector<2xf32>
    %108 = vector.multi_reduction <maximumf>, %107, %cst_71 [1] : vector<2x128xf32> to vector<2xf32>
    %109 = vector.shape_cast %108 : vector<2xf32> to vector<2x1xf32>
    %110 = vector.broadcast %109 : vector<2x1xf32> to vector<2x128xf32>
    %111 = arith.subf %107, %110 : vector<2x128xf32>
    %112 = math.exp %111 : vector<2x128xf32>
    %cst_72 = arith.constant dense<0.000000e+00> : vector<2xf32>
    %113 = vector.multi_reduction <add>, %112, %cst_72 [1] : vector<2x128xf32> to vector<2xf32>
    %114 = vector.shape_cast %113 : vector<2xf32> to vector<2x1xf32>
    %115 = tpu.reciprocal %114 {approx = true} : vector<2x1xf32> -> vector<2x1xf32>
    %116 = vector.broadcast %115 : vector<2x1xf32> to vector<2x128xf32>
    %117 = arith.mulf %112, %116 : vector<2x128xf32>
    %c0_73 = arith.constant 0 : index
    %c0_74 = arith.constant 0 : index
    %118 = vector.load %arg11[%c0_73, %c0_74] : memref<2x128xf32, #tpu.memory_space<vmem>>, vector<2x128xf32>
    tpu.vector_store %arg11[%c0_73, %c0_74], %117 {strides = array<i32>} : memref<2x128xf32, #tpu.memory_space<vmem>>, vector<2x128xf32>,
    return
  }
  func.func @transform_0(%arg0: i32) -> (i32, i32) {
    %c0_i32 = arith.constant 0 : i32
    %c0_i32_0 = arith.constant 0 : i32
    return %arg0, %c0_i32 : i32, i32
  }
  func.func @transform_1(%arg0: i32) -> (i32, i32) {
    %c0_i32 = arith.constant 0 : i32
    %c0_i32_0 = arith.constant 0 : i32
    %c0_i32_1 = arith.constant 0 : i32
    return %c0_i32, %c0_i32_0 : i32, i32
  }
  func.func @transform_2(%arg0: i32) -> (i32, i32) {
    %c0_i32 = arith.constant 0 : i32
    %c0_i32_0 = arith.constant 0 : i32
    %c0_i32_1 = arith.constant 0 : i32
    return %c0_i32, %c0_i32_0 : i32, i32
  }
  func.func @transform_3(%arg0: i32) -> (i32, i32) {
    %c0_i32 = arith.constant 0 : i32
    %c0_i32_0 = arith.constant 0 : i32
    %c0_i32_1 = arith.constant 0 : i32
    return %c0_i32, %c0_i32_0 : i32, i32
  }
  func.func @transform_4(%arg0: i32) -> (i32, i32) {
    %c0_i32 = arith.constant 0 : i32
    %c0_i32_0 = arith.constant 0 : i32
    %c0_i32_1 = arith.constant 0 : i32
    return %c0_i32, %c0_i32_0 : i32, i32
  }
  func.func @transform_5(%arg0: i32) -> (i32, i32) {
    %c0_i32 = arith.constant 0 : i32
    %c0_i32_0 = arith.constant 0 : i32
    %c0_i32_1 = arith.constant 0 : i32
    return %c0_i32, %c0_i32_0 : i32, i32
  }
  func.func @transform_6(%arg0: i32) -> (i32, i32) {
    %c0_i32 = arith.constant 0 : i32
    %c0_i32_0 = arith.constant 0 : i32
    %c0_i32_1 = arith.constant 0 : i32
    return %c0_i32, %c0_i32_0 : i32, i32
  }
  func.func @transform_7(%arg0: i32) -> (i32, i32) {
    %c0_i32 = arith.constant 0 : i32
    %c0_i32_0 = arith.constant 0 : i32
    %c0_i32_1 = arith.constant 0 : i32
    return %c0_i32, %c0_i32_0 : i32, i32
  }
  func.func @transform_8(%arg0: i32) -> (i32, i32) {
    %c0_i32 = arith.constant 0 : i32
    %c0_i32_0 = arith.constant 0 : i32
    %c0_i32_1 = arith.constant 0 : i32
    return %c0_i32, %c0_i32_0 : i32, i32
  }
  func.func @transform_9(%arg0: i32) -> (i32, i32) {
    %c0_i32 = arith.constant 0 : i32
    %c0_i32_0 = arith.constant 0 : i32
    %c0_i32_1 = arith.constant 0 : i32
    return %c0_i32, %c0_i32_0 : i32, i32
  }
  func.func @transform_10(%arg0: i32) -> (i32, i32) {
    %c0_i32 = arith.constant 0 : i32
    %c0_i32_0 = arith.constant 0 : i32
    return %arg0, %c0_i32 : i32, i32
  }
}

</mosaic_0001>

<bundles_post_ra>
// kernel: tpu_custom_call.1
= control target key start
LH: loop header
LB: loop body
LE: loop exit
PB: predicated region body
PF: predicated region fallthrough
CT: control target
= control target key end

     0   :  { %vm440_vm0 = vcmask 122880   ;;  %v1010_v2 = vmov 0   ;;  %v1011_v3 = vmov 0.0   ;;  %v39_v7 = vlaneseq  ;;  %s1228_s0 = inlined_call_operand.vmem [shape: s32[16,1], index: 0, kind: input, shape index: {}]   ;;  %s1229_s1 = inlined_call_operand.vmem [shape: bf16[128,32], index: 1, kind: input, shape index: {}]   ;;  %s1230_s2 = inlined_call_operand.vmem [shape: bf16[128,16], index: 2, kind: input, shape index: {}]   ;;  %s1231_s3 = inlined_call_operand.vmem [shape: f32[1,16], index: 3, kind: input, shape index: {}]   ;;  %s1232_s4 = inlined_call_operand.vmem [shape: bf16[48,8], index: 4, kind: input, shape index: {}]   ;;  %s1233_s5 = inlined_call_operand.vmem [shape: f32[1,8], index: 5, kind: input, shape index: {}]   ;;  %s1234_s6 = inlined_call_operand.vmem [shape: bf16[8,32], index: 6, kind: input, shape index: {}]   ;;  %s1235_s7 = inlined_call_operand.vmem [shape: f32[1,32], index: 7, kind: input, shape index: {}]   ;;  %s1236_s8 = inlined_call_operand.vmem [shape: bf16[32,128], index: 8, kind: input, shape index: {}]   ;;  %s1237_s9 = inlined_call_operand.vmem [shape: f32[1,128], index: 9, kind: input, shape index: {}]   ;;  %s1238_s10 = inlined_call_operand.hbm [shape: f32[2,128], index: 10, kind: output, shape index: {}]  }
   0x1   :  { %v37_v0 = vld [vmem:[%s1228_s0] sm:$0xff]  ;;  %947 = vset.pattern.permute.xlu0 %v1010_v2  ;;  %441 = vst.msk [vmem:[#allocation4 + $0x8] sm:$0x1] %vm440_vm0, %v1010_v2  ;;  %868 = vmatprep.subr.bf16.mxu0 %v1011_v3  ;;  %v950_v4 = vld [vmem:[%s1229_s1 + $0x8] sm:$0xff]   ;;  %v951_v6 = vld [vmem:[%s1229_s1 + $0x10] sm:$0xff]   ;;  %vm1012_vm1 = vmmov 0  }
   0x2   :  { %v949_v1 = vld [vmem:[%s1229_s1] sm:$0xff]   ;;  %42 = vperm.xlu0 %947, %v37_v0   ;;  %v38_v5 = vld [vmem:[%s1228_s0 + $0x8] sm:$0xff]  ;;  %948 = vset.pattern.permute.xlu1 %v1010_v2  ;;  %v1095_v8 = vshrl.u32 %v39_v7, 7  ;;  %vm186_vm2 = vcmp.ne.s32.totalorder %v37_v0, 0  ;;  %v952_v9 = vld [vmem:[%s1229_s1 + $0x18] sm:$0xff]  }
   0x3   :  { %869 = vmatpush3.bf16.msra.mxu0 %v949_v1  ;;  %888 = vmatprep.subr.bf16.mxu1 %v1011_v3  ;;  %vm187_vm3 = vcmp.ne.s32.totalorder %v38_v5, 0  ;;  %v953_v12 = vld [vmem:[%s1229_s1 + $0x20] sm:$0xff]   ;;  %v954_v15 = vld [vmem:[%s1229_s1 + $0x28] sm:$0xff]  }
   0x4   :  { %870 = vmatprep.subr.bf16.mxu0 %v1011_v3  ;;  %884 = vmatprep.mubr.msk.bf16.mxu0 %vm1012_vm1, %v1011_v3  ;;  %v166_v10 = vand.u32 7, %v1095_v8  ;;  %v161_v11 = vadd.s32 8, %v1095_v8 }
   0x5   :  { %904 = vmatprep.mubr.msk.bf16.mxu1 %vm1012_vm1, %v1011_v3 }
   0x6   :  { %45 = vperm.xlu0 %947, %v38_v5   ;;  %vm188_vm4 = vcmp.eq.s32.totalorder %v166_v10, 0  ;;  %v173_v13 = vand.u32 7, %v161_v11 }
   0x7   :  { %871 = vmatpush3.bf16.msra.mxu0 %v950_v4  ;;  %vm190_vm5 = vmor %vm186_vm2, %vm188_vm4 }
   0x8   :  { %872 = vmatprep.subr.bf16.mxu0 %v1011_v3  ;;  %v192_v14 = vsel %vm190_vm5, 1, %v1010_v2  ;;  %vm189_vm6 = vcmp.eq.s32.totalorder %v173_v13, 0 }
   0x9   :  { %195 = vperm.xlu1 %948, %v192_v14   ;;  %vm191_vm7 = vmor %vm187_vm3, %vm189_vm6 }
   0xa   :  { %v193_v16 = vsel %vm191_vm7, 1, %v1010_v2 }
   0xb   :  { %873 = vmatpush3.bf16.msra.mxu0 %v951_v6 }
   0xc   :  { %874 = vmatprep.subr.bf16.mxu0 %v1011_v3 }
   0xd   :  { %198 = vperm.xlu1 %948, %v193_v16  }
   0xf   :  { %875 = vmatpush3.bf16.msra.mxu0 %v952_v9 }
  0x10   :  { %876 = vmatprep.subr.bf16.mxu0 %v1011_v3 }
  0x13   :  { %877 = vmatpush3.bf16.msra.mxu0 %v953_v12 }
  0x14   :  { %878 = vmatprep.subr.bf16.mxu0 %v1011_v3 }
  0x15   :  { %15 = vsyncpa [#allocation7], 0  ;;  %v955_v17 = vld [vmem:[%s1229_s1 + $0x30] sm:$0xff]   ;;  %v956_v18 = vld [vmem:[%s1229_s1 + $0x38] sm:$0xff]   ;;  %v1122_v20 = vand.u32 127, %v39_v7  ;;  %vm215_vm11 = vcmask 254976  }
  0x16   :  { %v1013_v22 = vmov 1.0|1.0   ;;  %vm216_vm12 = vsmask.f32 1280  ;;  %v218_v23 = vld [vmem:[#allocation2 + $0x8] sm:$0x3] }
  0x17   :  { %879 = vmatpush3.bf16.msra.mxu0 %v954_v15  ;;  %vm217_vm13 = vmand %vm215_vm11, %vm216_vm12  ;;  %v963_v25 = vld [vmem:[%s1230_s2] sm:$0xff]   ;;  %v964_v26 = vld [vmem:[%s1230_s2 + $0x8] sm:$0xff]   ;;  %vm212_vm15 = vcmask 257024   ;;  %vm271_vm2 = vcmask 1046528   ;;  %vm229_vm3 = vcmask 261120   ;;  %s1014_s26 = smov 64  }
  0x18   :  { %880 = vmatprep.subr.bf16.mxu0 %v1011_v3  ;;  %v219_v24 = vsel %vm217_vm13, 0, %v218_v23  ;;  %889 = vmatpush3.bf16.msra.mxu1 %v963_v25  ;;  %v965_v27 = vld [vmem:[%s1230_s2 + $0x10] sm:$0xff]   ;;  %v966_v28 = vld [vmem:[%s1230_s2 + $0x18] sm:$0xff]   ;;  %v967_v39 = vld [vmem:[%s1230_s2 + $0x20] sm:$0xff]   ;;  %vm242_vm4 = vsmask.f32 7424 }
  0x19   :  { %220 = vst [vmem:[#allocation2 + $0x8] sm:$0x3] %v219_v24  ;;  %890 = vmatprep.subr.bf16.mxu1 %v1011_v3  ;;  %v969_v43 = vld [vmem:[%s1230_s2 + $0x28] sm:$0xff]   ;;  %v970_v53 = vld [vmem:[%s1230_s2 + $0x30] sm:$0xff]   ;;  %v971_v61 = vld [vmem:[%s1230_s2 + $0x38] sm:$0xff]   ;;  %s1015_s27 = smov 32  }
  0x1a   :  { %vm291_vm5 = vsmask.f32 6400  ;;  %s1016_s2 = smov 96   ;;  %vm258_vm6 = vcmask 523520   ;;  %vm278_vm7 = vcmask 785920   ;;  %v976_v25 = vld [vmem:[%s1232_s4] sm:$0xff]  }
  0x1b   :  { %881 = vmatpush3.bf16.msra.mxu0 %v955_v17  ;;  %v806_v13 = vld [vmem:[%s1231_s3] ss:$0 sm:$0xff]  ;;  %vm478_vm11 = vcmask 261248   ;;  %vm497_vm12 = vcmask 392448   ;;  %vm531_vm13 = vcmask 392192  }
  0x1c   :  { %882 = vmatprep.subr.bf16.mxu0 %v1011_v3  ;;  %891 = vmatpush3.bf16.msra.mxu1 %v964_v26  ;;  %v973_v26 = vld [vmem:[#allocation4 + $0x8] ss:$0 sps:$4 sm:$0x11]  }
  0x1d   :  { %892 = vmatprep.subr.bf16.mxu1 %v1011_v3 }
  0x1f   :  { %883 = vmatpush3.bf16.msra.mxu0 %v956_v18 }
  0x20   :  { %908 = vmatprep.subr.bf16.mxu0 %v1011_v3  ;;  %893 = vmatpush3.bf16.msra.mxu1 %v965_v27  ;;  %v958_v40 = vld [vmem:[#allocation2 + $0x8] ss:$0 sps:$4 sm:$0x11]   ;;  %v975_v27 = vld [vmem:[#allocation4 + $0x8] ss:$0 sps:$4 sm:$0x11]  }
  0x21   :  { %894 = vmatprep.subr.bf16.mxu1 %v1011_v3  ;;  %v960_v41 = vld [vmem:[#allocation2 + $0x8] ss:$0 sps:$4 sm:$0x11]   ;;  %v273_v44 = vrot.slane %v958_v40, 1 }
  0x22   :  { %v962_v42 = vld [vmem:[#allocation2 + $0x8] ss:$0 sps:$4 sm:$0x33]   ;;  %v251_v45 = vshll.u32 %v960_v41, 16 }
  0x23   :  { %v301_v46 = vshrl.u32 %v962_v42, 16  ;;  %v304_v47 = vshll.u32 %v962_v42, 16 }
  0x24   :  { %895 = vmatpush3.bf16.msra.mxu1 %v966_v28  ;;  %v253_v58 = vrot.slane %v251_v45, 1  ;;  %v978_v28 = vld [vmem:[%s1232_s4 + $0x8] sm:$0xff]  }
  0x25   :  { %896 = vmatprep.subr.bf16.mxu1 %v1011_v3  ;;  %v303_v59 = vrot.slane %v301_v46, 1  ;;  %v306_v60 = vrot.slane %v304_v47, 2  ;;  %v579_v46 = vmul.u32 8, %v1095_v8 }
  0x27   :  { %v307_v6 = vor.u32 %v306_v60, %v303_v59  ;;  %v581_v47 = vadd.s32 3, %v579_v46  ;;  %v632_v59 = vld [vmem:[%s1234_s6] sm:$0xf] }
  0x28   :  { %897 = vmatpush3.bf16.msra.mxu1 %v967_v39 }
  0x29   :  { %898 = vmatprep.subr.bf16.mxu1 %v1011_v3 }
  0x2c   :  { %899 = vmatpush3.bf16.msra.mxu1 %v969_v43 }
  0x2d   :  { %900 = vmatprep.subr.bf16.mxu1 %v1011_v3 }
  0x30   :  { %901 = vmatpush3.bf16.msra.mxu1 %v970_v53 }
  0x31   :  { %902 = vmatprep.subr.bf16.mxu1 %v1011_v3 }
  0x34   :  { %903 = vmatpush3.bf16.msra.mxu1 %v971_v61 }
  0x35   :  { %918 = vmatprep.subr.bf16.mxu1 %v1011_v3 }
  0x81   :  { %v43_v19 = vpop.permute.xlu0 %42 }
  0x82   :  { %vm47_vm8 = vcmp.eq.s32.totalorder %v43_v19, %v1122_v20 }
  0x85   :  { %v46_v21 = vpop.permute.xlu0 %45 }
  0x86   :  { %vm48_vm9 = vcmp.eq.s32.totalorder %v46_v21, %v1122_v20 }
  0x87   :  { %vm795_vm10 = vmpackc.low %vm48_vm9, %vm47_vm8  ;;  %vm312_vm8 = vcmask 1048320   ;;  %vm437_vm9 = vcmask 125952  }
  0x88   :  { %885 = vmatmul.mubr.msk.bf16.vlgmr.msra.gmra.mrb[0].mxu0 %vm795_vm10, %v1013_v22  ;;  %v196_v29 = vpop.permute.xlu1 %195  ;;  %vm450_vm10 = vcmask 130048  }
  0x89   :  { %914 = vmatprep.mubr.msk.bf16.mxu0 %vm1012_vm1, %v1011_v3  ;;  %vm200_vm14 = vcmp.eq.s32.totalorder %v196_v29, 1  ;;  %909 = vmatpush3.bf16.msra.mxu0 %v976_v25  ;;  %v492_v29 = vrot.slane %v973_v26, 1 }
  0x8a   :  { %910 = vmatprep.subr.bf16.mxu0 %v1011_v3 }
  0x8c   :  { %v199_v30 = vpop.permute.xlu1 %198 }
  0x8d   :  { %vm201_vm0 = vcmp.eq.s32.totalorder %v199_v30, 1  ;;  %911 = vmatpush3.bf16.msra.mxu0 %v978_v28  ;;  %v979_v30 = vld [vmem:[%s1232_s4 + $0x10] sm:$0xff]   ;;  %s1017_s4 = smov 16  }
  0x8e   :  { %912 = vmatprep.subr.bf16.mxu0 %v1011_v3 }
  0x91   :  { %913 = vmatpush3.bf16.msra.mxu0 %v979_v30 }
  0x92   :  { %930 = vmatprep.subr.bf16.mxu0 %v1011_v3 }
 0x15b   :  { %v152_v31 = vpop.f32.mrb[0].mxu0 }
 0x15c   :  { %v202_v32 = vsel %vm200_vm14, %v152_v31, 0.0  ;;  %v886_v33 = vpop.f32.mrb[1].mxu0  ;;  %vm580_vm14 = vcmp.ge.s32.totalorder %v1122_v20, %v579_v46 }
 0x15d   :  { %v835_v34 = vpack.c.bf16 %v202_v32, %v202_v32  ;;  %v155_v35 = vpop.f32.mrb[2].mxu0  ;;  %v471_v33 = vshll.u32 %v975_v27, 16 }
 0x15e   :  { %v203_v36 = vsel %vm201_vm0, %v155_v35, 0.0  ;;  %v887_v37 = vpop.f32.mrb[3].mxu0 }
 0x15f   :  { %213 = vst.msk [vmem:[#allocation2] sm:$0xf] %vm212_vm15, %v835_v34  ;;  %v836_v38 = vpack.c.bf16 %v203_v36, %v203_v36  ;;  %v473_v40 = vrot.slane %v471_v33, 1 }
 0x161   :  { %214 = vst.msk [vmem:[#allocation2 + $0x4] sm:$0xf] %vm212_vm15, %v836_v38  ;;  %vm582_vm15 = vcmp.lt.s32.totalorder %v1122_v20, %v581_v47 }
 0x162   :  { %vm583_vm0 = vmand %vm580_vm14, %vm582_vm15 }
 0x163   :  { %v827_v8 = vsel %vm583_vm0, 1.0, %v1011_v3 }
 0x168   :  { %v957_v48 = vld [vmem:[#allocation2] sm:$0xfe]  }
 0x169   :  { %v959_v49 = vld [vmem:[#allocation2] sm:$0xff]   ;;  %v272_v51 = vrot.slane %v957_v48, 1  ;;  %v822_v48 = vld [vmem:[%s1233_s5] ss:$0 sm:$0xff] }
 0x16a   :  { %v961_v50 = vld [vmem:[#allocation2] sm:$0xfe]   ;;  %v246_v54 = vshll.u32 %v959_v49, 16  ;;  %v244_v62 = vshrl.u32 %v959_v49, 16 }
 0x16b   :  { %v968_v52 = vld [vmem:[#allocation2] sm:$0xff]   ;;  %v293_v55 = vshrl.u32 %v961_v50, 16  ;;  %v296_v56 = vshll.u32 %v961_v50, 16  ;;  %v274_v57 = vsel %vm271_vm2, %v272_v51, %v273_v44 }
 0x16c   :  { %230 = vst.msk [vmem:[#allocation3] sm:$0xff] %vm229_vm3, %v968_v52  ;;  %275 = vrot.lane.b32.xlu1 %v274_v57, %s1014_s26  ;;  %v248_v63 = vrot.slane %v246_v54, 1 }
 0x16d   :  { %v295_v0 = vrot.slane %v293_v55, 1  ;;  %v298_v1 = vrot.slane %v296_v56, 2 }
 0x16e   :  { %v249_v2 = vor.u32 %v248_v63, %v244_v62 }
 0x16f   :  { %v299_v5 = vor.u32 %v298_v1, %v295_v0 }
 0x170   :  { %v254_v4 = vsel %vm242_vm4, %v249_v2, %v253_v58  ;;  %v586_v58 = vpack.c.bf16 %v827_v8, %v827_v8 }
 0x171   :  { %255 = vrot.lane.b32.xlu0 %v254_v4, %s1015_s27  ;;  %v308_v7 = vsel %vm291_vm5, %v299_v5, %v307_v6  ;;  %v980_v4 = vld [vmem:[%s1236_s8] sm:$0xff]   ;;  %v981_v5 = vld [vmem:[%s1236_s8 + $0x8] sm:$0xff]   ;;  %vm758_vm5 = vcmask 1041408  }
 0x172   :  { %v829_v6 = vld [vmem:[%s1235_s7] ss:$0 sm:$0xff]  ;;  %s1018_s7 = smov [#allocation6]  }
 0x173   :  { %s777_s8 = sshll.u32 %s1018_s7, 4  ;;  %s778_s8 = int_to_ptr.vmem [resolvable:$true] %s777_s8 }
 0x174   :  { %p991_p1 = scmp.lt.s32.totalorder %s778_s8, %s778_s8 }
 0x175   :  { %309 = vrot.lane.b32.xlu0 %v308_v7, %s1016_s2 }
 0x1de   :  { %v276_v10 = vpop.permute.xlu1 %275 }
 0x1e3   :  { %v256_v9 = vpop.permute.xlu0 %255 }
 0x1e4   :  { %259 = vst.msk [vmem:[#allocation3] sm:$0xff] %vm258_vm6, %v256_v9 }
 0x1e5   :  { %279 = vst.msk [vmem:[#allocation3] sm:$0xff] %vm278_vm7, %v276_v10 }
 0x1e7   :  { %v310_v11 = vpop.permute.xlu0 %309 }
 0x1e8   :  { %313 = vst.msk [vmem:[#allocation3] sm:$0xff] %vm312_vm8, %v310_v11 }
 0x1ef   :  { %v314_v12 = vld [vmem:[#allocation3] sm:$0xff] }
 0x1f0   :  { %905 = vmatmul.mubr.bf16.vlgmr.msra.gmra.mrb[0].mxu1 %v314_v12 }
 0x1f1   :  { %920 = vmatprep.mubr.msk.bf16.mxu1 %vm1012_vm1, %v1011_v3 }
 0x2c3   :  { %v420_v14 = vpop.f32.mrb[0].mxu1 }
 0x2c4   :  { %v421_v15 = vadd.f32 %v806_v13, %v420_v14  ;;  %v906_v16 = vpop.f32.mrb[1].mxu1 }
 0x2c5   :  { %v423_v17 = vpop.f32.mrb[2].mxu1 }
 0x2c6   :  { %v427_v18 = vmax.f32 %v421_v15, 0.0  ;;  %v424_v19 = vadd.f32 %v806_v13, %v423_v17  ;;  %v907_v21 = vpop.f32.mrb[3].mxu1 }
 0x2c8   :  { %v837_v22 = vpack.c.bf16 %v427_v18, %v427_v18  ;;  %v428_v23 = vmax.f32 %v424_v19, 0.0 }
 0x2ca   :  { %438 = vst.msk [vmem:[#allocation4] sm:$0xf] %vm437_vm9, %v837_v22  ;;  %v838_v24 = vpack.c.bf16 %v428_v23, %v428_v23 }
 0x2cc   :  { %439 = vst.msk [vmem:[#allocation4 + $0x4] sm:$0xf] %vm437_vm9, %v838_v24 }
 0x2d3   :  { %v972_v31 = vld [vmem:[#allocation4] sm:$0xfe]  }
 0x2d4   :  { %v974_v32 = vld [vmem:[#allocation4] sm:$0xff]   ;;  %v491_v35 = vrot.slane %v972_v31, 1 }
 0x2d5   :  { %v977_v34 = vld [vmem:[#allocation4] sm:$0xff]   ;;  %v466_v36 = vshll.u32 %v974_v32, 16  ;;  %v464_v38 = vshrl.u32 %v974_v32, 16 }
 0x2d6   :  { %451 = vst.msk [vmem:[#allocation5] sm:$0xff] %vm450_vm10, %v977_v34  ;;  %v493_v37 = vsel %vm271_vm2, %v491_v35, %v492_v29  ;;  %vm644_vm2 = vcmask 1043456  }
 0x2d7   :  { %494 = vrot.lane.b32.xlu0 %v493_v37, %s1015_s27  ;;  %v468_v39 = vrot.slane %v466_v36, 1  ;;  %v646_v60 = vsel %vm644_vm2, %v632_v59, 0 }
 0x2d9   :  { %v469_v41 = vor.u32 %v468_v39, %v464_v38 }
 0x2db   :  { %v474_v42 = vsel %vm242_vm4, %v469_v41, %v473_v40  ;;  %vm640_vm4 = vcmask 64512  }
 0x2dc   :  { %475 = vrot.lane.b32.xlu1 %v474_v42, %s1017_s4 }
 0x349   :  { %v495_v44 = vpop.permute.xlu0 %494 }
 0x34e   :  { %v476_v43 = vpop.permute.xlu1 %475 }
 0x34f   :  { %479 = vst.msk [vmem:[#allocation5] sm:$0xff] %vm478_vm11, %v476_v43 }
 0x350   :  { %498 = vst.msk [vmem:[#allocation5] sm:$0xff] %vm497_vm12, %v495_v44 }
 0x357   :  { %v499_v45 = vld [vmem:[#allocation5] sm:$0xff] }
 0x358   :  { %915 = vmatmul.mubr.msk.bf16.vlgmr.msra.gmra.mrb[4].mxu0 %vm531_vm13, %v499_v45 }
 0x359   :  { %934 = vmatprep.mubr.msk.bf16.mxu0 %vm1012_vm1, %v1011_v3  ;;  %931 = vmatpush3.bf16.msra.mxu0 %v980_v4 }
 0x35a   :  { %932 = vmatprep.subr.bf16.mxu0 %v1011_v3 }
 0x35d   :  { %933 = vmatpush3.bf16.msra.mxu0 %v981_v5 }
 0x42b   :  { %v569_v49 = vpop.f32.mrb[4].mxu0 }
 0x42c   :  { %v570_v50 = vadd.f32 %v822_v48, %v569_v49  ;;  %v916_v51 = vpop.f32.mrb[5].mxu0 }
 0x42d   :  { %v572_v52 = vpop.f32.mrb[6].mxu0 }
 0x42e   :  { %v573_v53 = vadd.f32 %v822_v48, %v572_v52  ;;  %v917_v54 = vpop.f32.mrb[7].mxu0  ;;  %v576_v55 = vmax.f32 %v570_v50, 0.0 }
 0x430   :  { %v577_v56 = vmax.f32 %v573_v53, 0.0 }
 0x432   :  { %v578_v57 = vpack.c.bf16 %v577_v56, %v576_v55 }
 0x434   :  { %919 = vmatpush3.bf16.msra.mxu1 %v578_v57 }
 0x435   :  { %924 = vmatprep.subr.bf16.mxu1 %v1011_v3 }
 0x437   :  { %921 = vmatmul.mubr.msk.bf16.vlgmr.msra.gmra.mrb[4].mxu1 %vm450_vm10, %v586_v58 }
 0x438   :  { %926 = vmatprep.mubr.msk.bf16.mxu1 %vm1012_vm1, %v1011_v3  ;;  %925 = vmatpush3.bf16.msra.mxu1 %v646_v60  ;;  %v831_v3 = vld [vmem:[%s1237_s9] ss:$0 sm:$0xff]  ;;  %vm756_vm1 = vcmp.lt.s32.totalorder %v1122_v20, 2  ;;  %s986_s9 = scalar_lea.vmem %s778_s8, 32 }
 0x439   :  { %p987_p0 = scmp.ne.s32.totalorder %s778_s8, %s986_s9  ;;  %p992_p2 = scmp.lt.s32.totalorder %s986_s9, %s986_s9 }
 0x43b   :  { %p993_p3 = por %p992_p2, %p991_p1 }
 0x43d   :  { %p994_p4 = pnand %p993_p3, %p987_p0 }
 0x50a   :  { %v624_v61 = vpop.f32.mrb[4].mxu1 }
 0x50b   :  { %v630_v62 = vmul.f32 0.33333334, %v624_v61  ;;  %v922_v63 = vpop.f32.mrb[5].mxu1 }
 0x50c   :  { %v627_v0 = vpop.f32.mrb[6].mxu1 }
 0x50d   :  { %v631_v1 = vpack.c.bf16 %v630_v62, %v630_v62  ;;  %v923_v2 = vpop.f32.mrb[7].mxu1 }
 0x50f   :  { %927 = vmatmul.mubr.msk.bf16.vlgmr.msra.gmra.mrb[8].mxu1 %vm640_vm4, %v631_v1 }
 0x5e2   :  { %v682_v7 = vpop.f32.mrb[8].mxu1 }
 0x5e3   :  { %v683_v9 = vadd.f32 %v829_v6, %v682_v7  ;;  %v928_v10 = vpop.f32.mrb[9].mxu1 }
 0x5e4   :  { %v685_v11 = vpop.f32.mrb[10].mxu1 }
 0x5e5   :  { %v688_v12 = vmax.f32 %v683_v9, 0.0  ;;  %v929_v13 = vpop.f32.mrb[11].mxu1 }
 0x5e7   :  { %v689_v14 = vpack.c.bf16 %v688_v12, %v688_v12 }
 0x5e9   :  { %935 = vmatmul.mubr.msk.bf16.vlgmr.msra.gmra.mrb[8].mxu0 %vm229_vm3, %v689_v14 }
 0x6bc   :  { %v750_v15 = vpop.f32.mrb[8].mxu0 }
 0x6bd   :  { %v751_v16 = vadd.f32 %v831_v3, %v750_v15  ;;  %v936_v17 = vpop.f32.mrb[9].mxu0 }
 0x6be   :  { %v753_v18 = vpop.f32.mrb[10].mxu0 }
 0x6bf   :  { %v757_v19 = vsel %vm756_vm1, %v751_v16, -1e+30  ;;  %v937_v21 = vpop.f32.mrb[11].mxu0 }
 0x6c0   :  { %v759_v22 = vsel %vm758_vm5, %v757_v19, -inf }
 0x6c1   :  { %760 = vmax.xlane.f32.xlu1 %v759_v22 }
 0x74e   :  { %v761_v23 = vpop.xlane.xlu1 %760 }
 0x74f   :  { %v762_v24 = vsub.f32 %v757_v19, %v761_v23 }
 0x751   :  { %v763_v25 = vmul.f32 1.442695, %v762_v24 }
 0x753   :  { %982 = vpow2.f32 %v763_v25 }
 0x75d   :  { %v983_v26 = vpop.eup %982 }
 0x75e   :  { %v765_v27 = vsel %vm758_vm5, %v983_v26, 0.0 }
 0x75f   :  { %766 = vadd.xlane.f32.xlu0 %v765_v27 }
 0x7ec   :  { %v767_v28 = vpop.xlane.xlu0 %766 }
 0x7ed   :  { %984 = vrcp.f32 %v767_v28 }
 0x7f7   :  { %v985_v20 = vpop.eup %984 }
 0x7f8   :  { %v769_v29 = vmul.f32 %v985_v20, %v983_v26 }
 0x7fa   :  { %770 = vst [vmem:[#allocation6] sm:$0x3] %v769_v29 }
 0x7fb   :  { %997 = shalt.err (!%p994_p4)
}
 0x7fc   :  { %s998_s25 = scalar_lea.hbm %s1238_s10, 32 }
 0x7fd   :  { %p999_p5 = scmp.ne.s32.totalorder %s1238_s10, %s998_s25  ;;  %p1002_p6 = scmp.lt.u32.totalorder %s998_s25, %s1238_s10 }
 0x7ff   :  { %p1004_p7 = pnand %p1002_p6, %p999_p5 }
 0x801   :  { %1007 = shalt.err (!%p1004_p7)
}
 0x802   :  { %780 = dma.vmem_to_hbm [thread:$0]  %s778_s8, 32, %s1238_s10, [#allocation7]  }
 0x803   :  { %1008 = dma.done.wait [#allocation7], 32  }
 0x804   :  { %1009 = vsyncadd [#allocation7], 4294967264 }
 0x805   :  { %784 = vsyncpa [#allocation7], 1 }

</bundles_post_ra>
